<compile_context>
chip_gen: v7x
topology: tpu7x:2x2x1
jax: 0.10.0
libtpu: 0.0.40
codegen_flags: <defaults>
</compile_context>

<pallas_src>
from functools import partial

import jax
import jax.numpy as jnp
import numpy as np
from jax.experimental import pallas as pl
from jax.experimental.pallas import tpu as pltpu


def _mlp_kernel(x_ref, w_ref, b_ref, o_ref):
    # x_ref block: (1, C, tn)   -- channels on sublanes, tokens on lanes (bf16)
    # w_ref      : (C, Cout)    -- bf16
    # b_ref      : (1, Cout)    -- f32
    # o_ref block: (1, tn, Cout)-- bf16
    x = x_ref[0]                                     # (C, tn)
    w = w_ref[...]                                   # (C, Cout)
    # out[n, d] = sum_c x[c, n] * w[c, d]  == (flatten + transpose + linear)
    out = jax.lax.dot_general(
        x, w,
        dimension_numbers=(((0,), (0,)), ((), ())),  # contract C with C
        preferred_element_type=jnp.float32)          # (tn, Cout), f32 acc
    out = out + b_ref[...]                           # bias in f32
    o_ref[0] = out.astype(o_ref.dtype)


def _vmem_budget_bytes():
    """3/4 of physical VMEM; conservative 48 MiB fallback (v7x-safe)."""
    try:
        cap = int(pltpu.get_tpu_info().vmem_capacity_bytes)
    except Exception:
        cap = 64 << 20
    return (cap * 3) // 4


def _tile_footprint_bytes(tn, C, Cout, in_itemsize, out_itemsize):
    # Double-buffered x/out tiles + (double-buffered) resident weight/bias
    # + the f32 matmul/epilogue temp.
    return (2 * C * tn * in_itemsize
            + 2 * tn * Cout * out_itemsize
            + 2 * C * Cout * in_itemsize
            + 2 * Cout * 4
            + tn * Cout * 4)


def _pick_token_tile(N, B, C, Cout, in_itemsize, out_itemsize, vmem_budget):
    def fits(tn):
        return _tile_footprint_bytes(tn, C, Cout, in_itemsize, out_itemsize) <= vmem_budget

    tn = None
    for cand in (2048, 1024, 512, 256, 128):
        if cand <= N and fits(cand):
            tn = cand
            break
    if tn is None:
        # Tiny N (< 128): one full-extent token block (always legal).
        return N

    # v7x has 2 TensorCores: keep >=2 parallel grid steps for small shapes.
    if B == 1:
        while tn >= 256 and pl.cdiv(N, tn) < 2:
            tn //= 2
    return tn


@partial(jax.jit, static_argnames=("compute_dtype", "out_dtype"))
def mlp_forward(x, w, b, *, compute_dtype=jnp.bfloat16, out_dtype=jnp.bfloat16):
    """x: (B, C, H, W); w: (C, Cout) == torch weight.T; b: (1, Cout).

    Returns (B, N, Cout) with N = H*W (matches x.flatten(2).transpose(1,2) @ W.T + b).
    """
    B, C, H, W = x.shape
    N = H * W
    Cin, Cout = w.shape
    assert Cin == C

    x2 = x.reshape(B, C, N).astype(compute_dtype)    # free reshape == flatten(2)
    w_c = w.astype(compute_dtype)
    b_c = b.reshape(1, Cout).astype(jnp.float32)     # bias added in f32

    in_itemsize = jnp.dtype(compute_dtype).itemsize
    out_itemsize = jnp.dtype(out_dtype).itemsize
    vmem_budget = _vmem_budget_bytes()

    tn = _pick_token_tile(N, B, C, Cout, in_itemsize, out_itemsize, vmem_budget)

    # Pad N up to a multiple of tn (ceil-div tiling without a giant fallback
    # block); padded token rows are sliced off the output below.
    n_tiles = pl.cdiv(N, tn)
    N_pad = n_tiles * tn
    if N_pad != N:
        x2 = jnp.pad(x2, ((0, 0), (0, 0), (0, N_pad - N)))

    grid = (B, n_tiles)

    need = _tile_footprint_bytes(tn, C, Cout, in_itemsize, out_itemsize)
    vmem_limit = int(min(max(2 * need, 8 << 20), vmem_budget))

    out = pl.pallas_call(
        _mlp_kernel,
        out_shape=jax.ShapeDtypeStruct((B, N_pad, Cout), out_dtype),
        grid_spec=pltpu.PrefetchScalarGridSpec(
            num_scalar_prefetch=0,
            grid=grid,
            in_specs=[
                pl.BlockSpec((1, C, tn), lambda bi, ni: (bi, 0, ni)),   # x
                pl.BlockSpec((C, Cout), lambda bi, ni: (0, 0)),         # w
                pl.BlockSpec((1, Cout), lambda bi, ni: (0, 0)),         # b
            ],
            out_specs=pl.BlockSpec((1, tn, Cout), lambda bi, ni: (bi, ni, 0)),
        ),
        compiler_params=pltpu.CompilerParams(
            dimension_semantics=("parallel", "parallel"),
            vmem_limit_bytes=vmem_limit),
    )(x2, w_c, b_c)

    if N_pad != N:
        out = out[:, :N, :]
    return out


def mlp_reference(x, w, b, compute_dtype=jnp.bfloat16):
    """Pure-JAX reference: flatten(2).transpose(1,2) then linear.

    Inputs are rounded to the kernel's compute dtype, accumulation is f32, so
    the only extra error in the kernel output is the final bf16 store rounding.
    """
    B, C, H, W = x.shape
    x_bnc = x.reshape(B, C, H * W).transpose(0, 2, 1)           # (B, N, C)
    xq = x_bnc.astype(compute_dtype).astype(jnp.float32)
    wq = w.astype(compute_dtype).astype(jnp.float32)
    return xq @ wq + b.reshape(1, 1, -1).astype(jnp.float32)


def init_params(key, in_chans, out_chans):
    kw, kb = jax.random.split(key)
    # Deterministic synthetic weights; stored (in, out) == torch weight.T
    w = 0.02 * jax.random.normal(kw, (in_chans, out_chans), jnp.float32)
    b = 0.02 * jax.random.normal(kb, (1, out_chans), jnp.float32)
    return w, b


if __name__ == "__main__":
    # Small SegFormer-ish shapes: embed_dim[idx]=32, embed_dim_out=128,
    # spatial 16x16 -> N = 256 tokens per image.
    B, C, H, W = 2, 32, 16, 16
    Cout = 128

    key = jax.random.PRNGKey(0)
    kx, kp = jax.random.split(key)
    x = jax.random.normal(kx, (B, C, H, W), jnp.float32)
    w, b = init_params(kp, C, Cout)

    out = jax.block_until_ready(mlp_forward(x, w, b))
    ref = jax.block_until_ready(mlp_reference(x, w, b))

    # Kernel output is bf16 (per perf feedback); tolerance covers bf16 rounding.
    np.testing.assert_allclose(np.asarray(out, dtype=np.float32),
                               np.asarray(ref),
                               rtol=2e-2, atol=2e-3)
    print("KERNEL_OK")
</pallas_src>

<mosaic_0001>
module attributes {stable_mosaic.version = 11 : i64} {
  func.func @_mlp_kernel(%arg0: i32, %arg1: i32, %arg2: memref<1x32x256xbf16, #tpu.memory_space<vmem>>, %arg3: memref<32x128xbf16, #tpu.memory_space<vmem>>, %arg4: memref<1x128xf32, #tpu.memory_space<vmem>>, %arg5: memref<1x256x128xbf16, #tpu.memory_space<vmem>>) attributes {dimension_semantics = [#tpu.dimension_semantics<parallel>, #tpu.dimension_semantics<parallel>], iteration_bounds = array<i64: 2, 1>, scalar_prefetch = 0 : i64, scratch_operands = 0 : i64, tpu.core_type = #tpu.core_type<tc>, window_params = [{transform_indices = @transform_0, window_bounds = array<i64: 1, 32, 256>}, {pipeline_mode = #tpu.pipeline_mode<synchronous>, transform_indices = @transform_1, window_bounds = array<i64: 32, 128>}, {pipeline_mode = #tpu.pipeline_mode<synchronous>, transform_indices = @transform_2, window_bounds = array<i64: 1, 128>}, {transform_indices = @transform_3, window_bounds = array<i64: 1, 256, 128>}]} {
    %c0 = arith.constant 0 : index
    %c0_0 = arith.constant 0 : index
    %c0_1 = arith.constant 0 : index
    %0 = vector.load %arg2[%c0, %c0_0, %c0_1] : memref<1x32x256xbf16, #tpu.memory_space<vmem>>, vector<1x32x256xbf16>
    %1 = vector.shape_cast %0 : vector<1x32x256xbf16> to vector<32x256xbf16>
    %c0_2 = arith.constant 0 : index
    %c0_3 = arith.constant 0 : index
    %2 = vector.load %arg3[%c0_2, %c0_3] : memref<32x128xbf16, #tpu.memory_space<vmem>>, vector<32x128xbf16>
    %cst = arith.constant dense<0.000000e+00> : vector<256x128xf32>
    %3 = tpu.matmul %1, %2, %cst {dimension_numbers = #tpu.dot_dimension_numbers<[0], [0], [1], [1], [0, 1, 1, 1], [], []>} : vector<32x256xbf16>, vector<32x128xbf16>, vector<256x128xf32> -> vector<256x128xf32>
    %c0_4 = arith.constant 0 : index
    %c0_5 = arith.constant 0 : index
    %4 = vector.load %arg4[%c0_4, %c0_5] : memref<1x128xf32, #tpu.memory_space<vmem>>, vector<1x128xf32>
    %5 = vector.broadcast %4 : vector<1x128xf32> to vector<256x128xf32>
    %6 = arith.addf %3, %5 : vector<256x128xf32>
    %7 = arith.truncf %6 : vector<256x128xf32> to vector<256x128xbf16>
    %c0_6 = arith.constant 0 : index
    %c0_7 = arith.constant 0 : index
    %c0_8 = arith.constant 0 : index
    %8 = vector.load %arg5[%c0_6, %c0_7, %c0_8] : memref<1x256x128xbf16, #tpu.memory_space<vmem>>, vector<1x256x128xbf16>
    %9 = vector.shape_cast %8 : vector<1x256x128xbf16> to vector<256x128xbf16>
    %10 = vector.shape_cast %7 : vector<256x128xbf16> to vector<1x256x128xbf16>
    tpu.vector_store %arg5[%c0_6, %c0_7, %c0_8], %10 {strides = array<i32>} : memref<1x256x128xbf16, #tpu.memory_space<vmem>>, vector<1x256x128xbf16>,
    return
  }
  func.func @transform_0(%arg0: i32, %arg1: i32) -> (i32, i32, i32) {
    %c0_i32 = arith.constant 0 : i32
    %c0_i32_0 = arith.constant 0 : i32
    return %arg0, %c0_i32, %arg1 : i32, i32, i32
  }
  func.func @transform_1(%arg0: i32, %arg1: i32) -> (i32, i32) {
    %c0_i32 = arith.constant 0 : i32
    %c0_i32_0 = arith.constant 0 : i32
    %c0_i32_1 = arith.constant 0 : i32
    return %c0_i32, %c0_i32_0 : i32, i32
  }
  func.func @transform_2(%arg0: i32, %arg1: i32) -> (i32, i32) {
    %c0_i32 = arith.constant 0 : i32
    %c0_i32_0 = arith.constant 0 : i32
    %c0_i32_1 = arith.constant 0 : i32
    return %c0_i32, %c0_i32_0 : i32, i32
  }
  func.func @transform_3(%arg0: i32, %arg1: i32) -> (i32, i32, i32) {
    %c0_i32 = arith.constant 0 : i32
    %c0_i32_0 = arith.constant 0 : i32
    return %arg0, %arg1, %c0_i32 : i32, i32, i32
  }
}

</mosaic_0001>

<bundles_post_ra>
// kernel: mlp_forward.1
= control target key start
LH: loop header
LB: loop body
LE: loop exit
PB: predicated region body
PF: predicated region fallthrough
CT: control target
= control target key end

     0   :  { %8 = vsyncpa [#allocation3], 0  ;;  %s1366_s0 = inlined_call_operand.vmem [shape: bf16[2,32,256], index: 0, kind: input, shape index: {}]   ;;  %s1367_s1 = inlined_call_operand.vmem [shape: bf16[32,128], index: 1, kind: input, shape index: {}]   ;;  %s1368_s2 = inlined_call_operand.vmem [shape: f32[1,128], index: 2, kind: input, shape index: {}]   ;;  %s1369_s3 = inlined_call_operand.hbm [shape: bf16[2,256,128], index: 3, kind: output, shape index: {}]  }
   0x1   :  { %10 = vsyncpa [#allocation3 + $0x1], 0  ;;  %s1169_s12 = smov 0   ;;  %s1171_s13 = smov 0  }
   0x2   :  { %s1173_s14 = smov 0   ;;  %s1175_s15 = smov 0  }
   0x3   :  { %s1177_s16 = smov 0   ;;  %s1179_s17 = smov 0  }
   0x4 LB: > { %s745_s18 = sadd.s32 4294967295, %s1144_s17   ;;  %s746_s19 = sadd.s32 4294967294, %s1144_s17   ;;  %s1144_s17 = sphi %s1179_s17, %s16_s17   ;;  %s1140_s16 = sphi %s1177_s16, %s1376_s16   ;;  %s1136_s15 = sphi %s1175_s15, %s1375_s15   ;;  %s1132_s14 = sphi %s1173_s14, %s1374_s14   ;;  %s1128_s13 = sphi %s1171_s13, %s1373_s13   ;;  %s1124_s12 = sphi %s1169_s12, %s1372_s12  }
   0x5   : > { %s28_s20 = sadd.s32 1, %s1140_s16  ;;  %s107_s21 = sadd.s32 1, %s1132_s14 }
   0x6   : > { %p30_p0 = scmp.ge.s32.totalorder %s28_s20, 2  ;;  %p117_p1 = scmp.ne.s32.totalorder %s1132_s14, %s1128_s13 }
   0x7   : > { %p118_p2 = scmp.eq.s32.totalorder %s745_s18, 1  ;;  %p123_p3 = scmp.ne.s32.totalorder %s1128_s13, %s1124_s12 }
   0x8   : > { %s1378_s20 = smov (%p30_p0, %s28_s20), 0  ;;  %p124_p5 = scmp.eq.s32.totalorder %s746_s19, 1 }
   0x9   : > { %p1209_p4 = por %p118_p2, %p117_p1  ;;  %s102_s23 = ssub.s32 %s1140_s16, %s1378_s20 }
   0xa   : > { %p749_p6 = scmp.ge.s32.totalorder %s1144_s17, 1  ;;  %p105_p7 = scmp.eq.s32.totalorder %s102_s23, 0 }
   0xb   : > { %p1216_p8 = por %p124_p5, %p123_p3  ;;  %p161_p9 = scmp.lt.s32.totalorder %s1144_s17, 3 }
   0xc   : > { %s1222_s25 = scalar_select %p105_p7, %s1132_s14, %s107_s21  }
   0xd   : > { %p162_p10 = pnand %p749_p6, %p161_p9 }
   0xe   : > { %p190_p11 = scmp.lt.s32.totalorder (!%p162_p10), %s1136_s15, 1  ;;  %v1064_v0 = vld [vmem:[%s1367_s1] sm:$0xff] (!%p162_p10)   ;;  %v1065_v1 = vld [vmem:[%s1367_s1 + $0x8] sm:$0xff] (!%p162_p10)   ;;  %vm280_vm0 = vcmask (!%p162_p10), 261120   ;;  %s186_s8 = sand.u32 (!%p162_p10), 1, %s1128_s13  }
   0xf   : > { %165 = sbr.rel (%p162_p10) target bundleno = 392 (0x188), region = 32  ;;  %960 = vmatprep.subr.bf16.mxu0 (!%p162_p10), %v1064_v0  ;;  %996 = vmatprep.subr.bf16.mxu1 (!%p162_p10), %v1064_v0  ;;  %v1255_v22 = vld [vmem:[%s1368_s2] ss:$0 sm:$0xff] (!%p162_p10)  ;;  %s750_s11 = sshll.u32 (!%p162_p10), %s186_s8, 7 }
  0x10   : > { %961 = vmatpush3.bf16.msra.mxu0 (!%p162_p10), %v1064_v0  ;;  %998 = vmatpush3.bf16.msra.mxu1 (!%p162_p10), %v1064_v0  ;;  %s1267_s18 = scalar_lea.vmem (!%p162_p10), [#allocation2], %s750_s11  ;;  %s846_s19 = sshll.u32 (!%p162_p10), %s1136_s15, 11 }
  0x11   : > { %962 = vmatprep.subr.bf16.mxu0 (!%p162_p10), %v1065_v1  ;;  %997 = vmatprep.subr.bf16.mxu1 (!%p162_p10), %v1065_v1  ;;  %s666_s21 = sshll.u32 (!%p162_p10), %s1267_s18, 4  ;;  %s1310_s26 = scalar_lea.hbm (!%p162_p10), %s1369_s3, %s846_s19  ;;  %s1312_s21 = int_to_ptr.vmem [resolvable:$true] %s666_s21 }
  0x12   : > { %s1320_s27 = scalar_lea.sflag (!%p162_p10), [#allocation3], %s186_s8  ;;  %s1146_s29 = smov (!%p162_p10), [#allocation2]  }
  0x13   : > { %s1070_s30 = sshll.u32 (!%p162_p10), %s1146_s29, 4  ;;  %s1071_s30 = int_to_ptr.vmem [resolvable:$false] %s1070_s30 }
  0x14   : > { %963 = vmatpush3.bf16.msra.mxu0 (!%p162_p10), %v1065_v1  ;;  %999 = vmatpush3.bf16.msra.mxu1 (!%p162_p10), %v1065_v1  ;;  %p1073_p1 = scmp.lt.s32.totalorder (!%p162_p10), %s1312_s21, %s1071_s30 }
  0x16   : > { %s191_s28 = scalar_select %p190_p11, %s1136_s15, 1 }
  0x18   : > { %s813_s4 = sshll.u32 %s191_s28, 5  ;;  %s1066_s28 = scalar_lea.vmem %s1312_s21, 2048 }
  0x19   : > { %s197_s7 = scalar_lea.vmem %s1366_s0, %s813_s4  ;;  %p1067_p12 = scmp.ne.s32.totalorder %s1312_s21, %s1066_s28 }
  0x1a   : > { %v1058_v2 = vld [vmem:[%s197_s7 + $0x4] ss:$8 sps:$4 sm:$0xff]   ;;  %v1060_v3 = vld [vmem:[%s197_s7] ss:$8 sps:$4 sm:$0xff]   ;;  %v1061_v4 = vld [vmem:[%s197_s7 + $0x14] ss:$8 sps:$4 sm:$0xff]  }
  0x1b   : > { %252 = vxpose.xlu1.c.b16.start [1/2] (short) %v1058_v2, 128  ;;  %236 = vxpose.xlu0.c.b16.start [1/2] (short) %v1060_v3, 128  ;;  %v1063_v5 = vld [vmem:[%s197_s7 + $0x10] ss:$8 sps:$4 sm:$0xff]   ;;  %p1068_p13 = pnand %p1067_p12, %p1209_p4  ;;  %s1072_s4 = scalar_lea.vmem %s1071_s30, 4096 }
  0x1c   : > { %p1074_p2 = scmp.lt.s32.totalorder %s1072_s4, %s1066_s28 }
  0x1d   : > { %p1069_p0 = pneg %p1068_p13 }
  0x1e   : > { %p1075_p3 = por %p1074_p2, %p1073_p1 }
  0x1f   : > { %253 = vxpose.xlu1.c.b16.end [2/2] (short) %v1061_v4, 128  ;;  %237 = vxpose.xlu0.c.b16.end [2/2] (short) %v1063_v5, 128 }
  0x20   : > { %p1076_p5 = pnand %p1075_p3, %p1069_p0 }
  0x81   : > { %v260_v6 = vpop.trf.xlu1  ;;  %v244_v7 = vpop.trf.xlu0 }
  0x82   : > { %980 = vmatprep.mubr.msk.bf16.mxu1 %vm280_vm0, %v260_v6  ;;  %964 = vmatprep.mubr.msk.bf16.mxu0 %vm280_vm0, %v244_v7 }
  0x85   : > { %v261_v8 = vpop.trf.xlu1  ;;  %v245_v9 = vpop.trf.xlu0 }
  0x86   : > { %981 = vmatmul.mubr.msk.bf16.vlgmr.msra.gmra.mrb[0].mxu1 %vm280_vm0, %v261_v8  ;;  %965 = vmatmul.mubr.msk.bf16.vlgmr.msra.gmra.mrb[0].mxu0 %vm280_vm0, %v245_v9 }
  0x89   : > { %v262_v10 = vpop.trf.xlu1  ;;  %v246_v11 = vpop.trf.xlu0 }
  0x8a   : > { %984 = vmatprep.mubr.msk.bf16.mxu1 %vm280_vm0, %v262_v10  ;;  %968 = vmatprep.mubr.msk.bf16.mxu0 %vm280_vm0, %v246_v11 }
  0x8d   : > { %v263_v12 = vpop.trf.xlu1  ;;  %v247_v13 = vpop.trf.xlu0 }
  0x8e   : > { %985 = vmatmul.mubr.msk.bf16.gmra.mrb[4].mxu1 %vm280_vm0, %v263_v12  ;;  %969 = vmatmul.mubr.msk.bf16.gmra.mrb[4].mxu0 %vm280_vm0, %v247_v13 }
  0x91   : > { %v264_v14 = vpop.trf.xlu1  ;;  %v248_v15 = vpop.trf.xlu0 }
  0x92   : > { %988 = vmatprep.mubr.msk.bf16.mxu1 %vm280_vm0, %v264_v14  ;;  %972 = vmatprep.mubr.msk.bf16.mxu0 %vm280_vm0, %v248_v15 }
  0x95   : > { %v265_v16 = vpop.trf.xlu1  ;;  %v249_v17 = vpop.trf.xlu0 }
  0x96   : > { %989 = vmatmul.mubr.msk.bf16.gmra.mrb[8].mxu1 %vm280_vm0, %v265_v16  ;;  %973 = vmatmul.mubr.msk.bf16.gmra.mrb[8].mxu0 %vm280_vm0, %v249_v17 }
  0x99   : > { %v266_v18 = vpop.trf.xlu1  ;;  %v250_v19 = vpop.trf.xlu0 }
  0x9a   : > { %992 = vmatprep.mubr.msk.bf16.mxu1 %vm280_vm0, %v266_v18  ;;  %976 = vmatprep.mubr.msk.bf16.mxu0 %vm280_vm0, %v250_v19 }
  0x9d   : > { %v267_v20 = vpop.trf.xlu1  ;;  %v251_v21 = vpop.trf.xlu0 }
  0x9e   : > { %993 = vmatmul.mubr.msk.bf16.gmra.mrb[12].mxu1 %vm280_vm0, %v267_v20  ;;  %977 = vmatmul.mubr.msk.bf16.gmra.mrb[12].mxu0 %vm280_vm0, %v251_v21 }
 0x159   : > { %v982_v23 = vpop.f32.mrb[0].mxu1  ;;  %v966_v24 = vpop.f32.mrb[0].mxu0 }
 0x15a   : > { %v427_v25 = vpop.f32.mrb[1].mxu1  ;;  %v363_v26 = vpop.f32.mrb[1].mxu0  ;;  %v436_v28 = vadd.f32 %v982_v23, %v1255_v22  ;;  %v372_v32 = vadd.f32 %v966_v24, %v1255_v22 }
 0x15b   : > { %v983_v27 = vpop.f32.mrb[2].mxu1  ;;  %v967_v29 = vpop.f32.mrb[2].mxu0  ;;  %v428_v33 = vadd.f32 %v1255_v22, %v427_v25  ;;  %v364_v37 = vadd.f32 %v1255_v22, %v363_v26 }
 0x15c   : > { %v439_v30 = vadd.f32 %v983_v27, %v1255_v22  ;;  %v430_v31 = vpop.f32.mrb[3].mxu1  ;;  %v375_v34 = vadd.f32 %v967_v29, %v1255_v22  ;;  %v366_v35 = vpop.f32.mrb[3].mxu0 }
 0x15d   : > { %v431_v36 = vadd.f32 %v1255_v22, %v430_v31  ;;  %v367_v39 = vadd.f32 %v1255_v22, %v366_v35 }
 0x15e   : > { %v895_v38 = vpack.c.bf16 %v439_v30, %v436_v28  ;;  %v855_v40 = vpack.c.bf16 %v375_v34, %v372_v32 }
 0x15f   : > { %v890_v41 = vpack.c.bf16 %v431_v36, %v428_v33  ;;  %v850_v42 = vpack.c.bf16 %v367_v39, %v364_v37 }
 0x160   : > { %935 = vst [vmem:[%s1267_s18 + $0x48] sm:$0xff] %v895_v38   ;;  %927 = vst [vmem:[%s1267_s18 + $0x8] sm:$0xff] %v855_v40  }
 0x161   : > { %934 = vst [vmem:[%s1267_s18 + $0x40] sm:$0xff] %v890_v41   ;;  %v986_v43 = vpop.f32.mrb[4].mxu1  ;;  %851 = vst [vmem:[%s1267_s18] sm:$0xff] %v850_v42   ;;  %v970_v44 = vpop.f32.mrb[4].mxu0 }
 0x162   : > { %v443_v45 = vpop.f32.mrb[5].mxu1  ;;  %v379_v46 = vpop.f32.mrb[5].mxu0  ;;  %v452_v48 = vadd.f32 %v986_v43, %v1255_v22  ;;  %v388_v52 = vadd.f32 %v970_v44, %v1255_v22 }
 0x163   : > { %v987_v47 = vpop.f32.mrb[6].mxu1  ;;  %v971_v49 = vpop.f32.mrb[6].mxu0  ;;  %v444_v53 = vadd.f32 %v1255_v22, %v443_v45  ;;  %v380_v57 = vadd.f32 %v1255_v22, %v379_v46 }
 0x164   : > { %v455_v50 = vadd.f32 %v987_v47, %v1255_v22  ;;  %v446_v51 = vpop.f32.mrb[7].mxu1  ;;  %v391_v54 = vadd.f32 %v971_v49, %v1255_v22  ;;  %v382_v55 = vpop.f32.mrb[7].mxu0 }
 0x165   : > { %v447_v56 = vadd.f32 %v1255_v22, %v446_v51  ;;  %v383_v59 = vadd.f32 %v1255_v22, %v382_v55 }
 0x166   : > { %v905_v58 = vpack.c.bf16 %v455_v50, %v452_v48  ;;  %v865_v60 = vpack.c.bf16 %v391_v54, %v388_v52 }
 0x167   : > { %v900_v61 = vpack.c.bf16 %v447_v56, %v444_v53  ;;  %v860_v62 = vpack.c.bf16 %v383_v59, %v380_v57 }
 0x168   : > { %937 = vst [vmem:[%s1267_s18 + $0x58] sm:$0xff] %v905_v58   ;;  %929 = vst [vmem:[%s1267_s18 + $0x18] sm:$0xff] %v865_v60  }
 0x169   : > { %936 = vst [vmem:[%s1267_s18 + $0x50] sm:$0xff] %v900_v61   ;;  %v990_v63 = vpop.f32.mrb[8].mxu1  ;;  %928 = vst [vmem:[%s1267_s18 + $0x10] sm:$0xff] %v860_v62   ;;  %v974_v0 = vpop.f32.mrb[8].mxu0 }
 0x16a   : > { %v459_v1 = vpop.f32.mrb[9].mxu1  ;;  %v395_v2 = vpop.f32.mrb[9].mxu0  ;;  %v468_v4 = vadd.f32 %v990_v63, %v1255_v22  ;;  %v404_v8 = vadd.f32 %v974_v0, %v1255_v22 }
 0x16b   : > { %v991_v3 = vpop.f32.mrb[10].mxu1  ;;  %v975_v5 = vpop.f32.mrb[10].mxu0  ;;  %v460_v9 = vadd.f32 %v1255_v22, %v459_v1  ;;  %v396_v13 = vadd.f32 %v1255_v22, %v395_v2 }
 0x16c   : > { %v471_v6 = vadd.f32 %v991_v3, %v1255_v22  ;;  %v462_v7 = vpop.f32.mrb[11].mxu1  ;;  %v407_v10 = vadd.f32 %v975_v5, %v1255_v22  ;;  %v398_v11 = vpop.f32.mrb[11].mxu0 }
 0x16d   : > { %v463_v12 = vadd.f32 %v1255_v22, %v462_v7  ;;  %v399_v15 = vadd.f32 %v1255_v22, %v398_v11 }
 0x16e   : > { %v915_v14 = vpack.c.bf16 %v471_v6, %v468_v4  ;;  %v875_v16 = vpack.c.bf16 %v407_v10, %v404_v8 }
 0x16f   : > { %v910_v17 = vpack.c.bf16 %v463_v12, %v460_v9  ;;  %v870_v18 = vpack.c.bf16 %v399_v15, %v396_v13 }
 0x170   : > { %939 = vst [vmem:[%s1267_s18 + $0x68] sm:$0xff] %v915_v14   ;;  %931 = vst [vmem:[%s1267_s18 + $0x28] sm:$0xff] %v875_v16  }
 0x171   : > { %938 = vst [vmem:[%s1267_s18 + $0x60] sm:$0xff] %v910_v17   ;;  %v994_v19 = vpop.f32.mrb[12].mxu1  ;;  %930 = vst [vmem:[%s1267_s18 + $0x20] sm:$0xff] %v870_v18   ;;  %v978_v20 = vpop.f32.mrb[12].mxu0 }
 0x172   : > { %v475_v21 = vpop.f32.mrb[13].mxu1  ;;  %v411_v23 = vpop.f32.mrb[13].mxu0  ;;  %v484_v25 = vadd.f32 %v994_v19, %v1255_v22  ;;  %v420_v29 = vadd.f32 %v978_v20, %v1255_v22 }
 0x173   : > { %v995_v24 = vpop.f32.mrb[14].mxu1  ;;  %v979_v26 = vpop.f32.mrb[14].mxu0  ;;  %v476_v30 = vadd.f32 %v1255_v22, %v475_v21  ;;  %v412_v34 = vadd.f32 %v1255_v22, %v411_v23 }
 0x174   : > { %v487_v27 = vadd.f32 %v995_v24, %v1255_v22  ;;  %v478_v28 = vpop.f32.mrb[15].mxu1  ;;  %v423_v31 = vadd.f32 %v979_v26, %v1255_v22  ;;  %v414_v32 = vpop.f32.mrb[15].mxu0 }
 0x175   : > { %v479_v33 = vadd.f32 %v1255_v22, %v478_v28  ;;  %v415_v36 = vadd.f32 %v1255_v22, %v414_v32 }
 0x176   : > { %v925_v35 = vpack.c.bf16 %v487_v27, %v484_v25  ;;  %v885_v37 = vpack.c.bf16 %v423_v31, %v420_v29 }
 0x177   : > { %v920_v38 = vpack.c.bf16 %v479_v33, %v476_v30  ;;  %v880_v39 = vpack.c.bf16 %v415_v36, %v412_v34 }
 0x178   : > { %941 = vst [vmem:[%s1267_s18 + $0x78] sm:$0xff] %v925_v35   ;;  %933 = vst [vmem:[%s1267_s18 + $0x38] sm:$0xff] %v885_v37  }
 0x179   : > { %940 = vst [vmem:[%s1267_s18 + $0x70] sm:$0xff] %v920_v38   ;;  %932 = vst [vmem:[%s1267_s18 + $0x30] sm:$0xff] %v880_v39  }
 0x17a   : > { %1079 = shalt.err (!%p1076_p5)
}
 0x17b   : > { %s1080_s5 = scalar_lea.hbm %s1310_s26, 2048  ;;  %s1084_s8 = scalar_lea.hbm %s1369_s3, 4096 }
 0x17c   : > { %p1081_p6 = scmp.ne.s32.totalorder %s1310_s26, %s1080_s5  ;;  %p1085_p10 = scmp.lt.u32.totalorder %s1310_s26, %s1369_s3 }
 0x17d   : > { %p1086_p11 = scmp.lt.u32.totalorder %s1084_s8, %s1080_s5  ;;  %p1088_p13 = scmp.lt.u32.totalorder %s1080_s5, %s1310_s26 }
 0x17e   : > { %p1082_p7 = pnand %p1081_p6, %p1209_p4 }
 0x17f   : > { %p1087_p12 = por %p1086_p11, %p1085_p10 }
 0x180   : > { %p1083_p9 = pneg %p1082_p7 }
 0x181   : > { %p1089_p0 = por %p1088_p13, %p1087_p12 }
 0x183   : > { %p1090_p1 = pnand %p1089_p0, %p1083_p9 }
 0x185   : > { %1093 = shalt.err (!%p1090_p1)
}
 0x186   : > { %s1147_s11 = smov 64   ;;  %s1148_s18 = smov 4  }
 0x187   : > { %1000 = dma.vmem_to_hbm [thread:$0]  (%p1209_p4), %s1312_s21, 2048, %s1310_s26, %s1320_s27, %s1147_s11, %s1147_s11, %s1148_s18  }
 0x188 PF: > { %p1006_p2 = scmp.ge.s32.totalorder %s1144_s17, 2  ;;  %s681_s19 = sand.u32 1, %s1124_s12  }
 0x189   : > { %s682_s15 = scalar_lea.sflag [#allocation3], %s681_s19 }
 0x18a   : > { %p1003_p3 = pnand %p1006_p2, %p1216_p8 }
 0x18c   : > { %1119 = dma.done.wait (!%p1003_p3), %s682_s15, 2048  }
 0x18d   : > { %1121 = vsyncadd (!%p1003_p3), %s682_s15, 4294965248  ;;  %s16_s17 = sadd.s32 1, %s1144_s17   ;;  %s1372_s12 = smov %s1128_s13 }
 0x18e   : > { %p13_p5 = scmp.ge.s32.totalorder %s16_s17, 4   ;;  %s1373_s13 = smov %s1132_s14 }
 0x18f   : > { %s1374_s14 = smov %s1222_s25  ;;  %s1375_s15 = smov %s1140_s16 }
 0x190   : > { %s1376_s16 = smov %s1378_s20  ;;  %15 = sbr.rel (!%p13_p5) target bundleno = 4 (0x4), region = 67 }
 0x197   :  { %687 = vsyncpa [#allocation3], 1 }
 0x198   :  { %689 = vsyncpa [#allocation3 + $0x1], 1 }

</bundles_post_ra>
